<compile_context>
chip_gen: v5e
topology: v5e:2x2
jax: 0.10.0
libtpu: 0.0.40
codegen_flags: <defaults>
</compile_context>

<pallas_src>
import math

import jax
import jax.numpy as jnp
from jax.experimental import pallas as pl
from jax.experimental.pallas import tpu as pltpu


def _mlp_kernel(x_ref, wfc_ref, wproj_ref, o_ref, acc_ref):
    # x_ref:     (tm, n_embd)   input row tile (constant across hidden axis)
    # wfc_ref:   (n_embd, th)   chunk of fc weight, (in, out) layout
    # wproj_ref: (th, n_embd)   chunk of proj weight, (in, out) layout
    # o_ref:     (tm, n_embd)   output row tile
    # acc_ref:   (tm, n_embd)   f32 VMEM accumulator
    k = pl.program_id(1)
    nk = pl.num_programs(1)

    # c_fc chunk: (tm, th), MXU with f32 accumulation
    h = jnp.dot(x_ref[...], wfc_ref[...], preferred_element_type=jnp.float32)

    # exact GELU in f32 (matches torch F.gelu default, approximate='none')
    inv_sqrt2 = jnp.float32(1.0 / math.sqrt(2.0))
    h = 0.5 * h * (1.0 + jax.lax.erf(h * inv_sqrt2))

    # c_proj partial for this hidden chunk: (tm, n_embd)
    partial = jnp.dot(h.astype(wproj_ref.dtype), wproj_ref[...],
                      preferred_element_type=jnp.float32)

    @pl.when(k == 0)
    def _():
        acc_ref[...] = partial          # first chunk: store, no zero-init pass

    @pl.when(k > 0)
    def _():
        acc_ref[...] += partial

    @pl.when(k == nk - 1)
    def _():
        o_ref[...] = acc_ref[...].astype(o_ref.dtype)


def _round_up(a, b):
    return ((a + b - 1) // b) * b


def _pick_hidden_tile(hidden, target=1024):
    """Largest multiple of 128 that divides `hidden` and is <= target, else hidden."""
    if hidden <= target or hidden % 128 != 0:
        return hidden
    for t in range(target, 127, -128):
        if hidden % t == 0:
            return t
    return hidden


def prepare_mlp_weights(w_fc, w_proj, compute_dtype=None):
    """One-time weight prep: transpose torch (out,in) -> (in,out); optional cast.

    Call this at parameter-load time, NOT inside the forward path.
    """
    wfc_t = jnp.transpose(w_fc)      # (n_embd, 4*n_embd)
    wproj_t = jnp.transpose(w_proj)  # (4*n_embd, n_embd)
    if compute_dtype is not None:
        wfc_t = wfc_t.astype(compute_dtype)
        wproj_t = wproj_t.astype(compute_dtype)
    return wfc_t, wproj_t


def mlp_forward(x, wfc_t, wproj_t, *, tm=256, th=None, compute_dtype=None):
    """x: (..., n_embd); wfc_t: (n_embd, 4n); wproj_t: (4n, n_embd) (pre-transposed)."""
    n_embd = x.shape[-1]
    hidden = wfc_t.shape[1]
    assert wfc_t.shape == (n_embd, hidden)
    assert wproj_t.shape == (hidden, n_embd)

    orig_shape = x.shape
    out_dtype = x.dtype
    x2d = x.reshape(-1, n_embd)
    if compute_dtype is not None:
        x2d = x2d.astype(compute_dtype)
    M = x2d.shape[0]

    # Row tile: multiple of the sublane packing (8 for 32-bit, 16 for 16-bit),
    # capped at `tm`; pad ragged row counts so every grid step is a full tile.
    sub = 16 if jnp.dtype(x2d.dtype).itemsize == 2 else 8
    tm_eff = max(sub, min(_round_up(tm, sub), _round_up(M, sub)))
    M_pad = _round_up(M, tm_eff)
    if M_pad != M:
        x2d = jnp.pad(x2d, ((0, M_pad - M), (0, 0)))

    # Hidden-dimension tile (bounds VMEM: only weight chunks are resident).
    if th is None:
        th = _pick_hidden_tile(hidden)
    assert hidden % th == 0, "hidden tile must divide 4*n_embd"

    # Explicit scoped-VMEM budget from the chosen tiles (double-buffered inputs
    # and output, f32 accumulator + f32 intermediate), with headroom.
    x_item = jnp.dtype(x2d.dtype).itemsize
    w_item = jnp.dtype(wfc_t.dtype).itemsize
    o_item = jnp.dtype(out_dtype).itemsize
    need = (2 * tm_eff * n_embd * x_item      # x tiles
            + 2 * n_embd * th * w_item        # wfc tiles
            + 2 * th * n_embd * w_item        # wproj tiles
            + 2 * tm_eff * n_embd * o_item    # out tiles
            + tm_eff * n_embd * 4             # f32 accumulator
            + tm_eff * th * 4)                # f32 h chunk
    vmem_limit = min(int(need * 1.5) + (4 << 20), 128 << 20)

    # Advisory cost hint for XLA's scheduler around the custom call.
    cost = pl.CostEstimate(
        flops=4 * M_pad * n_embd * hidden,                    # two matmuls
        transcendentals=M_pad * hidden,                       # erf per hidden act
        bytes_accessed=(M_pad * n_embd * (x_item + o_item)
                        + 2 * hidden * n_embd * w_item),
    )

    out = pl.pallas_call(
        _mlp_kernel,
        out_shape=jax.ShapeDtypeStruct((M_pad, n_embd), out_dtype),
        grid_spec=pltpu.PrefetchScalarGridSpec(
            num_scalar_prefetch=0,
            grid=(M_pad // tm_eff, hidden // th),     # reduction axis last
            in_specs=[
                pl.BlockSpec((tm_eff, n_embd), lambda i, k: (i, 0)),
                pl.BlockSpec((n_embd, th), lambda i, k: (0, k)),
                pl.BlockSpec((th, n_embd), lambda i, k: (k, 0)),
            ],
            out_specs=pl.BlockSpec((tm_eff, n_embd), lambda i, k: (i, 0)),
            scratch_shapes=[pltpu.VMEM((tm_eff, n_embd), jnp.float32)],
        ),
        compiler_params=pltpu.CompilerParams(
            dimension_semantics=("parallel", "arbitrary"),
            vmem_limit_bytes=vmem_limit),
        cost_estimate=cost,
    )(x2d, wfc_t, wproj_t)

    return out[:M].reshape(orig_shape)


if __name__ == "__main__":
    # Small GPT-ish config: batch=2, seq=8, n_embd=32 (hidden = 4*32 = 128)
    batch, seq, n_embd = 2, 8, 32
    hidden = 4 * n_embd

    key = jax.random.PRNGKey(0)
    kx, kfc, kproj = jax.random.split(key, 3)

    x = jax.random.normal(kx, (batch, seq, n_embd), dtype=jnp.float32)
    # deterministic "Linear" weights in torch layout (out_features, in_features)
    w_fc = jax.random.normal(kfc, (hidden, n_embd), dtype=jnp.float32) * (1.0 / math.sqrt(n_embd))
    w_proj = jax.random.normal(kproj, (n_embd, hidden), dtype=jnp.float32) * (1.0 / math.sqrt(hidden))

    # one-time weight prep (kept out of the forward path)
    wfc_t, wproj_t = prepare_mlp_weights(w_fc, w_proj)
    # TODO(synk): for v6e/v7x serving, pass compute_dtype=jnp.bfloat16 here and above.

    y = mlp_forward(x, wfc_t, wproj_t)
    jax.block_until_ready(y)

    # reference check in plain JAX (exact-erf gelu, matching F.gelu default)
    h_ref = x @ w_fc.T
    h_ref = 0.5 * h_ref * (1.0 + jax.lax.erf(h_ref / jnp.sqrt(2.0)))
    y_ref = h_ref @ w_proj.T
    assert jnp.allclose(y, y_ref, atol=1e-4, rtol=1e-4), "mismatch vs reference"

    print("KERNEL_OK")
</pallas_src>

<mosaic_0001>
module attributes {stable_mosaic.version = 11 : i64} {
  func.func @_mlp_kernel(%arg0: i32, %arg1: i32, %arg2: memref<16x32xf32, #tpu.memory_space<vmem>>, %arg3: memref<32x128xf32, #tpu.memory_space<vmem>>, %arg4: memref<128x32xf32, #tpu.memory_space<vmem>>, %arg5: memref<16x32xf32, #tpu.memory_space<vmem>>, %arg6: memref<16x32xf32, #tpu.memory_space<vmem>>) attributes {dimension_semantics = [#tpu.dimension_semantics<parallel>, #tpu.dimension_semantics<arbitrary>], iteration_bounds = array<i64: 1, 1>, scalar_prefetch = 0 : i64, scratch_operands = 1 : i64, tpu.core_type = #tpu.core_type<tc>, window_params = [{transform_indices = @transform_0, window_bounds = array<i64: 16, 32>}, {transform_indices = @transform_1, window_bounds = array<i64: 32, 128>}, {transform_indices = @transform_2, window_bounds = array<i64: 128, 32>}, {transform_indices = @transform_3, window_bounds = array<i64: 16, 32>}]} {
    %c0 = arith.constant 0 : index
    %c0_0 = arith.constant 0 : index
    %0 = vector.load %arg2[%c0, %c0_0] : memref<16x32xf32, #tpu.memory_space<vmem>>, vector<16x32xf32>
    %c0_1 = arith.constant 0 : index
    %c0_2 = arith.constant 0 : index
    %1 = vector.load %arg3[%c0_1, %c0_2] : memref<32x128xf32, #tpu.memory_space<vmem>>, vector<32x128xf32>
    %cst = arith.constant dense<0.000000e+00> : vector<16x128xf32>
    %2 = tpu.matmul %0, %1, %cst {dimension_numbers = #tpu.dot_dimension_numbers<[1], [0], [0], [1], [0, 0, 1, 1], [], []>} : vector<16x32xf32>, vector<32x128xf32>, vector<16x128xf32> -> vector<16x128xf32>
    %cst_3 = arith.constant 5.000000e-01 : f32
    %3 = vector.broadcast %cst_3 : f32 to vector<16x128xf32>
    %4 = arith.mulf %3, %2 : vector<16x128xf32>
    %cst_4 = arith.constant 0.707106769 : f32
    %5 = vector.broadcast %cst_4 : f32 to vector<16x128xf32>
    %6 = arith.mulf %2, %5 : vector<16x128xf32>
    %7 = math.erf %6 : vector<16x128xf32>
    %cst_5 = arith.constant 1.000000e+00 : f32
    %8 = vector.broadcast %cst_5 : f32 to vector<16x128xf32>
    %9 = arith.addf %8, %7 : vector<16x128xf32>
    %10 = arith.mulf %4, %9 : vector<16x128xf32>
    %c0_6 = arith.constant 0 : index
    %c0_7 = arith.constant 0 : index
    %11 = vector.load %arg4[%c0_6, %c0_7] : memref<128x32xf32, #tpu.memory_space<vmem>>, vector<128x32xf32>
    %cst_8 = arith.constant dense<0.000000e+00> : vector<16x32xf32>
    %12 = tpu.matmul %10, %11, %cst_8 {dimension_numbers = #tpu.dot_dimension_numbers<[1], [0], [0], [1], [0, 0, 1, 1], [], []>} : vector<16x128xf32>, vector<128x32xf32>, vector<16x32xf32> -> vector<16x32xf32>
    %c0_i32 = arith.constant 0 : i32
    %13 = arith.cmpi eq, %arg1, %c0_i32 : i32
    %14 = arith.extui %13 : i1 to i32
    %c0_i32_9 = arith.constant 0 : i32
    %15 = arith.cmpi ne, %14, %c0_i32_9 : i32
    scf.if %15 {
      %c0_14 = arith.constant 0 : index
      %c0_15 = arith.constant 0 : index
      %22 = vector.load %arg6[%c0_14, %c0_15] : memref<16x32xf32, #tpu.memory_space<vmem>>, vector<16x32xf32>
      tpu.vector_store %arg6[%c0_14, %c0_15], %12 {strides = array<i32>} : memref<16x32xf32, #tpu.memory_space<vmem>>, vector<16x32xf32>,
    } else {
    }
    %c0_i32_10 = arith.constant 0 : i32
    %16 = arith.cmpi sgt, %arg1, %c0_i32_10 : i32
    %17 = arith.extui %16 : i1 to i32
    %c0_i32_11 = arith.constant 0 : i32
    %18 = arith.cmpi ne, %17, %c0_i32_11 : i32
    scf.if %18 {
      %c0_14 = arith.constant 0 : index
      %c0_15 = arith.constant 0 : index
      %22 = vector.load %arg6[%c0_14, %c0_15] : memref<16x32xf32, #tpu.memory_space<vmem>>, vector<16x32xf32>
      %23 = arith.addf %22, %12 : vector<16x32xf32>
      %c0_16 = arith.constant 0 : index
      %c0_17 = arith.constant 0 : index
      %24 = vector.load %arg6[%c0_16, %c0_17] : memref<16x32xf32, #tpu.memory_space<vmem>>, vector<16x32xf32>
      tpu.vector_store %arg6[%c0_16, %c0_17], %23 {strides = array<i32>} : memref<16x32xf32, #tpu.memory_space<vmem>>, vector<16x32xf32>,
    } else {
    }
    %c0_i32_12 = arith.constant 0 : i32
    %19 = arith.cmpi eq, %arg1, %c0_i32_12 : i32
    %20 = arith.extui %19 : i1 to i32
    %c0_i32_13 = arith.constant 0 : i32
    %21 = arith.cmpi ne, %20, %c0_i32_13 : i32
    scf.if %21 {
      %c0_14 = arith.constant 0 : index
      %c0_15 = arith.constant 0 : index
      %22 = vector.load %arg6[%c0_14, %c0_15] : memref<16x32xf32, #tpu.memory_space<vmem>>, vector<16x32xf32>
      %c0_16 = arith.constant 0 : index
      %c0_17 = arith.constant 0 : index
      %23 = vector.load %arg5[%c0_16, %c0_17] : memref<16x32xf32, #tpu.memory_space<vmem>>, vector<16x32xf32>
      tpu.vector_store %arg5[%c0_16, %c0_17], %22 {strides = array<i32>} : memref<16x32xf32, #tpu.memory_space<vmem>>, vector<16x32xf32>,
    } else {
    }
    return
  }
  func.func @transform_0(%arg0: i32, %arg1: i32) -> (i32, i32) {
    %c0_i32 = arith.constant 0 : i32
    %c0_i32_0 = arith.constant 0 : i32
    return %arg0, %c0_i32 : i32, i32
  }
  func.func @transform_1(%arg0: i32, %arg1: i32) -> (i32, i32) {
    %c0_i32 = arith.constant 0 : i32
    %c0_i32_0 = arith.constant 0 : i32
    return %c0_i32, %arg1 : i32, i32
  }
  func.func @transform_2(%arg0: i32, %arg1: i32) -> (i32, i32) {
    %c0_i32 = arith.constant 0 : i32
    %c0_i32_0 = arith.constant 0 : i32
    return %arg1, %c0_i32 : i32, i32
  }
  func.func @transform_3(%arg0: i32, %arg1: i32) -> (i32, i32) {
    %c0_i32 = arith.constant 0 : i32
    %c0_i32_0 = arith.constant 0 : i32
    return %arg0, %c0_i32 : i32, i32
  }
}

</mosaic_0001>

<bundles_post_ra>
// kernel: tpu_custom_call.1
= control target key start
LH: loop header
LB: loop body
LE: loop exit
PB: predicated region body
PF: predicated region fallthrough
CT: control target
= control target key end

     0   :  { %s400_s0 = inlined_call_operand.vmem [shape: f32[16,32], index: 0, kind: input, shape index: {}]   ;;  %s401_s1 = inlined_call_operand.vmem [shape: f32[32,128], index: 1, kind: input, shape index: {}]   ;;  %s402_s2 = inlined_call_operand.vmem [shape: f32[128,32], index: 2, kind: input, shape index: {}]   ;;  %s403_s3 = inlined_call_operand.hbm [shape: f32[16,32], index: 3, kind: output, shape index: {}]  }
   0x1   :  { %v20_v0 = vld [vmem:[%s401_s1 + $0x18] sm:$0xff]  ;;  %v19_v1 = vld [vmem:[%s401_s1 + $0x10] sm:$0xff]  ;;  %v18_v2 = vld [vmem:[%s401_s1 + $0x8] sm:$0xff] }
   0x2   :  { %40 = vmatpush.msra.mxu0 %v20_v0 }
   0x3   :  { %8 = vsyncpa [#allocation4], 0  ;;  %v17_v3 = vld [vmem:[%s401_s1] sm:$0xff]  ;;  %vm21_vm0 = vcmask 261120   ;;  %v16_v5 = vld [vmem:[%s400_s0 + $0x8] sm:$0xff]  ;;  %s273_s29 = smov 128  }
   0x4   :  { %41 = vmatpush.msra.mxu0 %v19_v1  ;;  %v15_v4 = vld [vmem:[%s400_s0] sm:$0xff]  ;;  %v154_v6 = vld [vmem:[%s402_s2 + $0x78] sm:$0xff]  ;;  %v153_v7 = vld [vmem:[%s402_s2 + $0x70] sm:$0xff]  ;;  %s207_s0 = sshll.u32 %s403_s3, 4  ;;  %s274_s30 = smov 8   ;;  %s208_s0 = int_to_ptr.hbm [resolvable:$true] %s207_s0 }
   0x5   :  { %155 = vmatpush.msra.mxu1 %v154_v6  ;;  %223 = vmatpush.msra.mxu2 %v154_v6  ;;  %v152_v8 = vld [vmem:[%s402_s2 + $0x68] sm:$0xff]  ;;  %v151_v9 = vld [vmem:[%s402_s2 + $0x60] sm:$0xff]  ;;  %v150_v10 = vld [vmem:[%s402_s2 + $0x58] sm:$0xff] }
   0x6   :  { %42 = vmatpush.msra.mxu0 %v18_v2  ;;  %v149_v11 = vld [vmem:[%s402_s2 + $0x50] sm:$0xff]  ;;  %v148_v13 = vld [vmem:[%s402_s2 + $0x48] sm:$0xff]  ;;  %v147_v15 = vld [vmem:[%s402_s2 + $0x40] sm:$0xff] }
   0x7   :  { %156 = vmatpush.msra.mxu1 %v153_v7  ;;  %224 = vmatpush.msra.mxu2 %v153_v7  ;;  %v146_v17 = vld [vmem:[%s402_s2 + $0x38] sm:$0xff]  ;;  %v145_v18 = vld [vmem:[%s402_s2 + $0x30] sm:$0xff]  ;;  %v144_v20 = vld [vmem:[%s402_s2 + $0x28] sm:$0xff] }
   0x8   :  { %43 = vmatpush.msra.mxu0 %v17_v3  ;;  %v143_v24 = vld [vmem:[%s402_s2 + $0x20] sm:$0xff]  ;;  %v142_v27 = vld [vmem:[%s402_s2 + $0x18] sm:$0xff]  ;;  %v141_v31 = vld [vmem:[%s402_s2 + $0x10] sm:$0xff] }
   0x9   :  { %219 = vmatmul.msk.f32.vlgmr.msra.gmra.mxu0 %vm21_vm0, %v15_v4  ;;  %157 = vmatpush.msra.mxu1 %v152_v8  ;;  %v140_v34 = vld [vmem:[%s402_s2 + $0x8] sm:$0xff]  ;;  %v139_v39 = vld [vmem:[%s402_s2] sm:$0xff]  ;;  %s272_s2 = smov [#allocation3]  }
   0xa   :  { %225 = vmatpush.msra.mxu2 %v152_v8  ;;  %s205_s26 = sshll.u32 %s272_s2, 4  ;;  %s206_s26 = int_to_ptr.vmem [resolvable:$true] %s205_s26 }
   0xb   :  { %158 = vmatpush.msra.mxu1 %v151_v9 }
   0xc   :  { %226 = vmatpush.msra.mxu2 %v151_v9 }
   0xd   :  { %159 = vmatpush.msra.mxu1 %v150_v10 }
   0xe   :  { %227 = vmatpush.msra.mxu2 %v150_v10 }
   0xf   :  { %160 = vmatpush.msra.mxu1 %v149_v11 }
  0x10   :  { %228 = vmatpush.msra.mxu2 %v149_v11 }
  0x11   :  { %220 = vmatmul.msk.f32.gmra.mxu0 %vm21_vm0, %v16_v5  ;;  %161 = vmatpush.msra.mxu1 %v148_v13 }
  0x12   :  { %229 = vmatpush.msra.mxu2 %v148_v13 }
  0x13   :  { %162 = vmatpush.msra.mxu1 %v147_v15 }
  0x14   :  { %230 = vmatpush.msra.mxu2 %v147_v15 }
  0x15   :  { %163 = vmatpush.msra.mxu1 %v146_v17 }
  0x16   :  { %231 = vmatpush.msra.mxu2 %v146_v17 }
  0x17   :  { %164 = vmatpush.msra.mxu1 %v145_v18 }
  0x18   :  { %232 = vmatpush.msra.mxu2 %v145_v18 }
  0x19   :  { %165 = vmatpush.msra.mxu1 %v144_v20 }
  0x1a   :  { %233 = vmatpush.msra.mxu2 %v144_v20 }
  0x1b   :  { %166 = vmatpush.msra.mxu1 %v143_v24 }
  0x1c   :  { %234 = vmatpush.msra.mxu2 %v143_v24 }
  0x1d   :  { %167 = vmatpush.msra.mxu1 %v142_v27 }
  0x1e   :  { %235 = vmatpush.msra.mxu2 %v142_v27 }
  0x1f   :  { %168 = vmatpush.msra.mxu1 %v141_v31 }
  0x20   :  { %236 = vmatpush.msra.mxu2 %v141_v31 }
  0x21   :  { %169 = vmatpush.msra.mxu1 %v140_v34 }
  0x22   :  { %237 = vmatpush.msra.mxu2 %v140_v34 }
  0x23   :  { %170 = vmatpush.msra.mxu1 %v139_v39 }
  0x24   :  { %238 = vmatpush.msra.mxu2 %v139_v39 }
  0x86   :  { %v333_v12 = vpop.f32.mrf.mxu0 }
  0x87   :  { %v339_v14 = vmul.f32 0.70710677, %v333_v12 }
  0x89   :  { %v55_v16 = vmul.f32 %v339_v14, %v339_v14 }
  0x8b   :  { %v352_v19 = vmin.f32 %v55_v16, 16.0 }
  0x8d   :  { %v57_v21 = vmul.f32 2.1237322e-06, %v352_v19  ;;  %v68_v22 = vmul.f32 3.8918573e-05, %v352_v19 }
  0x8e   :  { %v359_v23 = vpop.f32.mrf.mxu0 }
  0x8f   :  { %v58_v25 = vadd.f32 0.00028619796, %v57_v21  ;;  %v365_v26 = vmul.f32 0.70710677, %v359_v23  ;;  %v69_v28 = vadd.f32 0.001143296, %v68_v22 }
  0x91   :  { %v59_v29 = vmul.f32 %v58_v25, %v352_v19  ;;  %v95_v30 = vmul.f32 %v365_v26, %v365_v26  ;;  %v70_v32 = vmul.f32 %v69_v28, %v352_v19 }
  0x93   :  { %v96_v33 = vmin.f32 %v95_v30, 16.0  ;;  %v71_v35 = vadd.f32 0.014752088, %v70_v32  ;;  %v60_v36 = vadd.f32 0.0036580483, %v59_v29  ;;  %v51_v30 = vmul.f32 0.5, %v333_v12 }
  0x95   :  { %v97_v37 = vmul.f32 2.1237322e-06, %v96_v33  ;;  %v108_v38 = vmul.f32 3.8918573e-05, %v96_v33  ;;  %v72_v40 = vmul.f32 %v71_v35, %v352_v19  ;;  %v61_v44 = vmul.f32 %v60_v36, %v352_v19 }
  0x97   :  { %v98_v41 = vadd.f32 0.00028619796, %v97_v37  ;;  %v109_v42 = vadd.f32 0.001143296, %v108_v38  ;;  %v73_v43 = vadd.f32 0.112945676, %v72_v40 }
  0x98   :  { %v62_v51 = vadd.f32 0.05243302, %v61_v44  ;;  %v52_v38 = vmul.f32 0.5, %v359_v23 }
  0x99   :  { %v99_v45 = vmul.f32 %v98_v41, %v96_v33  ;;  %v110_v46 = vmul.f32 %v109_v42, %v96_v33  ;;  %v74_v47 = vmul.f32 %v73_v43, %v352_v19 }
  0x9a   :  { %v63_v57 = vmul.f32 %v62_v51, %v352_v19 }
  0x9b   :  { %v111_v48 = vadd.f32 0.014752088, %v110_v46  ;;  %v100_v49 = vadd.f32 0.0036580483, %v99_v45  ;;  %v75_v50 = vadd.f32 0.4994258, %v74_v47 }
  0x9c   :  { %v64_v61 = vadd.f32 0.18741608, %v63_v57 }
  0x9d   :  { %v112_v52 = vmul.f32 %v111_v48, %v96_v33  ;;  %v76_v53 = vmul.f32 %v75_v50, %v352_v19  ;;  %v101_v55 = vmul.f32 %v100_v49, %v96_v33 }
  0x9e   :  { %v65_v2 = vmul.f32 %v64_v61, %v352_v19 }
  0x9f   :  { %v113_v54 = vadd.f32 0.112945676, %v112_v52  ;;  %v77_v56 = vadd.f32 1.0, %v76_v53  ;;  %v102_v60 = vadd.f32 0.05243302, %v101_v55 }
  0xa0   :  { %v66_v7 = vadd.f32 1.1283791, %v65_v2 }
  0xa1   :  { %v114_v58 = vmul.f32 %v113_v54, %v96_v33  ;;  %242 = vrcp.f32 %v77_v56  ;;  %v103_v1 = vmul.f32 %v102_v60, %v96_v33  ;;  %v89_v6 = vand.u32 2147483648, %v77_v56 }
  0xa2   :  { %v87_v9 = vand.u32 2147483647, %v77_v56  ;;  %vm83_vm2 = vweird.f32 %v77_v56  ;;  %v67_v17 = vmul.f32 %v66_v7, %v339_v14 }
  0xa3   :  { %v115_v59 = vadd.f32 0.4994258, %v114_v58  ;;  %v104_v5 = vadd.f32 0.18741608, %v103_v1  ;;  %v90_v15 = vor.u32 1.1754944e-38, %v89_v6 }
  0xa4   :  { %vm88_vm4 = vcmp.eq.f32.partialorder %v87_v9, 8.507059e+37 }
  0xa5   :  { %v116_v62 = vmul.f32 %v115_v59, %v96_v33  ;;  %v105_v13 = vmul.f32 %v104_v5, %v96_v33 }
  0xa7   :  { %v117_v63 = vadd.f32 1.0, %v116_v62  ;;  %v243_v0 = vpop.eup %242  ;;  %v106_v24 = vadd.f32 1.1283791, %v105_v13 }
  0xa8   :  { %v79_v3 = vmul.f32 %v243_v0, %v77_v56  ;;  %vm84_vm1 = vweird.f32 %v243_v0 }
  0xa9   :  { %244 = vrcp.f32 %v117_v63  ;;  %vm85_vm3 = vmor %vm83_vm2, %vm84_vm1  ;;  %v129_v22 = vand.u32 2147483648, %v117_v63  ;;  %v127_v27 = vand.u32 2147483647, %v117_v63  ;;  %vm123_vm6 = vweird.f32 %v117_v63 }
  0xaa   :  { %v80_v4 = vsub.f32 1.0, %v79_v3  ;;  %v107_v14 = vmul.f32 %v106_v24, %v365_v26 }
  0xab   :  { %v130_v32 = vor.u32 1.1754944e-38, %v129_v22  ;;  %vm128_vm8 = vcmp.eq.f32.partialorder %v127_v27, 8.507059e+37 }
  0xac   :  { %v81_v8 = vmul.f32 %v243_v0, %v80_v4 }
  0xae   :  { %v82_v11 = vadd.f32 %v243_v0, %v81_v8 }
  0xaf   :  { %v245_v10 = vpop.eup %244 }
  0xb0   :  { %v119_v16 = vmul.f32 %v245_v10, %v117_v63  ;;  %v86_v18 = vsel %vm85_vm3, %v243_v0, %v82_v11  ;;  %vm124_vm5 = vweird.f32 %v245_v10 }
  0xb1   :  { %v91_v19 = vsel %vm88_vm4, %v90_v15, %v86_v18  ;;  %vm125_vm7 = vmor %vm123_vm6, %vm124_vm5 }
  0xb2   :  { %v120_v20 = vsub.f32 1.0, %v119_v16  ;;  %v92_v21 = vmul.f32 %v91_v19, %v67_v17 }
  0xb4   :  { %v121_v25 = vmul.f32 %v245_v10, %v120_v20  ;;  %v221_v28 = vclamps-f32 %v92_v21, 1.0 }
  0xb6   :  { %v122_v29 = vadd.f32 %v245_v10, %v121_v25  ;;  %v135_v31 = vadd.f32 1.0, %v221_v28 }
  0xb8   :  { %v126_v33 = vsel %vm125_vm7, %v245_v10, %v122_v29  ;;  %v137_v34 = vmul.f32 %v135_v31, %v51_v30 }
  0xb9   :  { %v131_v35 = vsel %vm128_vm8, %v130_v32, %v126_v33 }
  0xba   :  { %v132_v36 = vmul.f32 %v131_v35, %v107_v14  ;;  %171 = vmatmul.f32.vlgmr.msra.gmra.mxu1 %v137_v34 }
  0xbc   :  { %v222_v37 = vclamps-f32 %v132_v36, 1.0 }
  0xbe   :  { %v136_v39 = vadd.f32 1.0, %v222_v37 }
  0xc0   :  { %v138_v40 = vmul.f32 %v136_v39, %v52_v38 }
  0xc2   :  { %174 = vmatmul.f32.vlgmr.msra.gmra.mxu2 %v138_v40 }
 0x137   :  { %v172_v41 = vpop.f32.mrf.mxu1 }
 0x138   :  { %182 = vst.msk [vmem:[#allocation2] sm:$0xff] %vm21_vm0, %v172_v41 }
 0x13f   :  { %v197_v12 = vld [vmem:[#allocation2] sm:$0xff] }
 0x140   :  { %199 = vst.msk [vmem:[#allocation3] sm:$0xff] %vm21_vm0, %v197_v12 }
 0x145   :  { %v175_v42 = vpop.f32.mrf.mxu2 }
 0x146   :  { %183 = vst.msk [vmem:[#allocation2 + $0x8] sm:$0xff] %vm21_vm0, %v175_v42 }
 0x14d   :  { %v198_v23 = vld [vmem:[#allocation2 + $0x8] sm:$0xff] }
 0x14e   :  { %200 = vst.msk [vmem:[#allocation3 + $0x8] sm:$0xff] %vm21_vm0, %v198_v23 }
 0x14f   :  { %213 = dma.vmem_to_hbm [thread:$0]  %s206_s26, 256, %s208_s0, [#allocation4], %s273_s29, %s273_s29, %s274_s30  }
 0x150   :  { %270 = dma.done.wait [#allocation4], 256  }
 0x151   :  { %271 = vsyncadd [#allocation4], 4294967040 }
 0x152   :  { %218 = vsyncpa [#allocation4], 1 }

</bundles_post_ra>
